<compile_context>
chip_gen: v6e
topology: v6e:2x2x1
jax: 0.10.0
libtpu: 0.0.40
codegen_flags: <defaults>
</compile_context>

<pallas_src>
import functools

import jax
import jax.numpy as jnp
from jax.experimental import pallas as pl
from jax.experimental.pallas import tpu as pltpu

_LANE = 128                        # TPU lane width
_MXU = 256                         # v6e/v7x MXU width -> keep lane tiles 256-multiples
_ROW_CAP = 1024                    # max rows per block
_VMEM_BUDGET = 24 * 1024 * 1024    # pipelined-buffer planning budget (fits v7x scoped default)
_VMEM_LIMIT = 48 * 1024 * 1024     # explicit scoped limit (> v5e 16 MiB default, < v7x 64 MiB phys)


def _round_up(x: int, m: int) -> int:
    return (x + m - 1) // m * m


def _cdiv(a: int, b: int) -> int:
    return -(-a // b)


def _pad_hidden(h: int) -> int:
    # Lane dims must be 128-multiples; prefer 256-multiples so tiles fill the
    # 256-wide MXU on v6e/v7x (a 128-wide tile only half-fills it).
    return _LANE if h <= _LANE else _round_up(h, _MXU)


def _plan_rows(m_min: int, tm_max: int):
    """Row tile: multiple of 8, balanced across blocks to minimize over-padding."""
    tm_max = max(8, (min(m_min, tm_max) // 8) * 8)
    n_blocks = _cdiv(m_min, tm_max)
    tm = _round_up(_cdiv(m_min, n_blocks), 8)
    return tm, n_blocks * tm


# ---------------------------------------------------------------------------
# Kernels
# ---------------------------------------------------------------------------

def _proj_kernel_fullk(x_ref, wt_ref, b_ref, o_ref):
    """Full-contraction tile: one MXU matmul + bias + tanh epilogue (no k loop)."""
    acc = jnp.dot(x_ref[...], wt_ref[...], preferred_element_type=jnp.float32)
    o_ref[...] = jnp.tanh(acc + b_ref[...]).astype(o_ref.dtype)


def _proj_kernel_splitk(x_ref, wt_ref, b_ref, o_ref, acc_ref):
    """Split-K tile: f32 accumulator across the (last) contraction grid axis."""
    k = pl.program_id(2)

    @pl.when(k == 0)
    def _():
        acc_ref[...] = jnp.zeros_like(acc_ref)

    acc_ref[...] += jnp.dot(x_ref[...], wt_ref[...],
                            preferred_element_type=jnp.float32)

    @pl.when(k == pl.num_programs(2) - 1)
    def _():
        o_ref[...] = jnp.tanh(acc_ref[...] + b_ref[...]).astype(o_ref.dtype)


# ---------------------------------------------------------------------------
# One-time parameter prep (hoisted out of the forward path)
# ---------------------------------------------------------------------------

def prepare_projection_params(weight, bias, compute_dtype=jnp.bfloat16):
    """weight: [H, H] (PyTorch nn.Linear layout), bias: [H].

    Returns (wt, b): wt = zero-padded W.T in the MXU compute dtype, b = padded
    [1, H_pad] f32 bias.  Transpose, cast and padding happen once here so the
    forward path never re-touches the weight in HBM outside the kernel.
    """
    weight = jnp.asarray(weight, jnp.float32)
    bias = jnp.asarray(bias, jnp.float32)
    H = weight.shape[0]
    H_pad = _pad_hidden(H)
    wt = jnp.zeros((H_pad, H_pad), compute_dtype)
    wt = wt.at[:H, :H].set(weight.T.astype(compute_dtype))
    b = jnp.zeros((1, H_pad), jnp.float32).at[:, :H].set(bias[None, :])
    return wt, b


# ---------------------------------------------------------------------------
# Forward
# ---------------------------------------------------------------------------

@functools.partial(jax.jit, static_argnames=("out_dtype",))
def projection_forward(features, wt, bias, *, out_dtype=None):
    """features: [B, H]; wt: [H_pad, H_pad] pre-transposed/padded; bias: [1, H_pad]."""
    B, H = features.shape
    H_pad = wt.shape[0]
    assert wt.shape == (H_pad, H_pad) and bias.shape == (1, H_pad) and H <= H_pad

    out_dtype = features.dtype if out_dtype is None else jnp.dtype(out_dtype)
    compute_dtype = wt.dtype
    c_isz = jnp.dtype(compute_dtype).itemsize
    o_isz = jnp.dtype(out_dtype).itemsize

    M_min = _round_up(B, 8)

    # ---- column (lane) tile: multiples of 256 whenever H_pad allows --------
    if H_pad <= _LANE:
        tn = H_pad
    elif H_pad % 512 == 0:
        tn = 512
    else:
        tn = 256  # H_pad is a 256-multiple by construction

    # ---- try the full-K plan: whole contraction resident per tile ----------
    def _fullk_row_cap(tn_):
        fixed = 2 * H_pad * tn_ * c_isz + 2 * tn_ * 4       # wt + bias (double-buffered)
        per_row = 2 * H_pad * c_isz + 2 * tn_ * o_isz       # x + out (double-buffered)
        return (_VMEM_BUDGET - fixed) // per_row if _VMEM_BUDGET > fixed else 0

    row_cap = _fullk_row_cap(tn)
    if row_cap < 8 and tn > 256 and H_pad % 256 == 0:
        tn = 256
        row_cap = _fullk_row_cap(tn)

    if row_cap >= 8:
        # -------- 2-D grid: no k axis, no accumulator, no pl.when -----------
        tm, M_pad = _plan_rows(M_min, min(row_cap, _ROW_CAP))
        grid_i, grid_j = M_pad // tm, H_pad // tn
        # v7x megacore: keep >= 2 blocks on the parallel axes when cheap.
        if grid_i * grid_j == 1 and tn >= 512:
            tn //= 2
            grid_j = H_pad // tn

        kernel = _proj_kernel_fullk
        grid = (grid_i, grid_j)
        in_specs = [
            pl.BlockSpec((tm, H_pad), lambda i, j: (i, 0)),   # x row block, full K
            pl.BlockSpec((H_pad, tn), lambda i, j: (0, j)),   # W.T column block, full K
            pl.BlockSpec((1, tn), lambda i, j: (0, j)),       # bias
        ]
        out_spec = pl.BlockSpec((tm, tn), lambda i, j: (i, j))
        scratch = []
        dim_sem = ("parallel", "parallel")
    else:
        # -------- 3-D split-K fallback for very large hidden sizes ----------
        tm, M_pad = _plan_rows(M_min, 256)
        tk = 256
        for cand in (2048, 1024, 512):
            foot = (2 * tm * cand * c_isz + 2 * cand * tn * c_isz
                    + 2 * tn * 4 + 2 * tm * tn * o_isz + tm * tn * 4)
            if H_pad % cand == 0 and foot <= _VMEM_BUDGET:
                tk = cand
                break
        kernel = _proj_kernel_splitk
        grid = (M_pad // tm, H_pad // tn, H_pad // tk)
        in_specs = [
            pl.BlockSpec((tm, tk), lambda i, j, k: (i, k)),
            pl.BlockSpec((tk, tn), lambda i, j, k: (k, j)),
            pl.BlockSpec((1, tn), lambda i, j, k: (0, j)),
        ]
        out_spec = pl.BlockSpec((tm, tn), lambda i, j, k: (i, j))
        scratch = [pltpu.VMEM((tm, tn), jnp.float32)]
        dim_sem = ("parallel", "parallel", "arbitrary")

    # ---- per-call work outside the kernel: one cast/pad pass over x only ---
    x = features.astype(compute_dtype)
    if (M_pad, H_pad) != (B, H):
        x = jnp.zeros((M_pad, H_pad), compute_dtype).at[:B, :H].set(x)

    cost = pl.CostEstimate(
        flops=2 * M_pad * H_pad * H_pad,
        transcendentals=M_pad * H_pad,
        bytes_accessed=(
            M_pad * H_pad * c_isz * (H_pad // tn)      # x (re-read per column block)
            + H_pad * H_pad * c_isz * (M_pad // tm)    # W.T (re-read per row block)
            + H_pad * 4                                # bias
            + M_pad * H_pad * o_isz                    # output
        ),
    )

    out = pl.pallas_call(
        kernel,
        out_shape=jax.ShapeDtypeStruct((M_pad, H_pad), out_dtype),
        grid_spec=pltpu.PrefetchScalarGridSpec(
            num_scalar_prefetch=0,
            grid=grid,
            in_specs=in_specs,
            out_specs=out_spec,
            scratch_shapes=scratch,
        ),
        compiler_params=pltpu.CompilerParams(
            dimension_semantics=dim_sem,
            vmem_limit_bytes=_VMEM_LIMIT,
        ),
        cost_estimate=cost,
    )(x, wt, bias)

    if (M_pad, H_pad) != (B, H):
        out = out[:B, :H]
    return out


def _reference(features, weight, bias):
    return jnp.tanh(features @ weight.T + bias)


if __name__ == "__main__":
    key = jax.random.PRNGKey(0)
    k_x, k_w, k_b, k_x2, k_w2, k_b2 = jax.random.split(key, 6)

    # --- small shape consistent with the module (CLS projection head) -------
    batch, hidden = 8, 32
    features = jax.random.normal(k_x, (batch, hidden), dtype=jnp.float32)
    weight = jax.random.normal(k_w, (hidden, hidden), dtype=jnp.float32) * 0.02
    bias = jax.random.normal(k_b, (hidden,), dtype=jnp.float32) * 0.02

    wt, b = prepare_projection_params(weight, bias)        # one-time param prep
    out = jax.block_until_ready(projection_forward(features, wt, b))
    ref = _reference(features, weight, bias)
    assert out.shape == (batch, hidden) and out.dtype == features.dtype
    assert jnp.allclose(out, ref, atol=2e-2, rtol=2e-2), "mismatch (small shape)"

    # --- second shape exercising hidden padding + multi-column grid ---------
    batch2, hidden2 = 24, 384
    features2 = jax.random.normal(k_x2, (batch2, hidden2), dtype=jnp.float32)
    weight2 = jax.random.normal(k_w2, (hidden2, hidden2), dtype=jnp.float32) * 0.02
    bias2 = jax.random.normal(k_b2, (hidden2,), dtype=jnp.float32) * 0.02

    wt2, b2 = prepare_projection_params(weight2, bias2)
    out2 = jax.block_until_ready(projection_forward(features2, wt2, b2))
    ref2 = _reference(features2, weight2, bias2)
    assert out2.shape == (batch2, hidden2)
    assert jnp.allclose(out2, ref2, atol=2e-2, rtol=2e-2), "mismatch (padded shape)"

    print("KERNEL_OK")
</pallas_src>

<mosaic_0001>
module attributes {stable_mosaic.version = 11 : i64} {
  func.func @_proj_kernel_fullk(%arg0: i32, %arg1: i32, %arg2: memref<8x128xbf16, #tpu.memory_space<vmem>>, %arg3: memref<128x128xbf16, #tpu.memory_space<vmem>>, %arg4: memref<1x128xf32, #tpu.memory_space<vmem>>, %arg5: memref<8x128xf32, #tpu.memory_space<vmem>>) attributes {dimension_semantics = [#tpu.dimension_semantics<parallel>, #tpu.dimension_semantics<parallel>], iteration_bounds = array<i64: 1, 1>, scalar_prefetch = 0 : i64, scratch_operands = 0 : i64, tpu.core_type = #tpu.core_type<tc>, window_params = [{transform_indices = @transform_0, window_bounds = array<i64: 8, 128>}, {transform_indices = @transform_1, window_bounds = array<i64: 128, 128>}, {transform_indices = @transform_2, window_bounds = array<i64: 1, 128>}, {transform_indices = @transform_3, window_bounds = array<i64: 8, 128>}]} {
    %c0 = arith.constant 0 : index
    %c0_0 = arith.constant 0 : index
    %0 = vector.load %arg2[%c0, %c0_0] : memref<8x128xbf16, #tpu.memory_space<vmem>>, vector<8x128xbf16>
    %c0_1 = arith.constant 0 : index
    %c0_2 = arith.constant 0 : index
    %1 = vector.load %arg3[%c0_1, %c0_2] : memref<128x128xbf16, #tpu.memory_space<vmem>>, vector<128x128xbf16>
    %cst = arith.constant dense<0.000000e+00> : vector<8x128xf32>
    %2 = tpu.matmul %0, %1, %cst {dimension_numbers = #tpu.dot_dimension_numbers<[1], [0], [0], [1], [0, 0, 1, 1], [], []>} : vector<8x128xbf16>, vector<128x128xbf16>, vector<8x128xf32> -> vector<8x128xf32>
    %c0_3 = arith.constant 0 : index
    %c0_4 = arith.constant 0 : index
    %3 = vector.load %arg4[%c0_3, %c0_4] : memref<1x128xf32, #tpu.memory_space<vmem>>, vector<1x128xf32>
    %4 = vector.broadcast %3 : vector<1x128xf32> to vector<8x128xf32>
    %5 = arith.addf %2, %4 : vector<8x128xf32>
    %6 = math.tanh %5 : vector<8x128xf32>
    %c0_5 = arith.constant 0 : index
    %c0_6 = arith.constant 0 : index
    %7 = vector.load %arg5[%c0_5, %c0_6] : memref<8x128xf32, #tpu.memory_space<vmem>>, vector<8x128xf32>
    tpu.vector_store %arg5[%c0_5, %c0_6], %6 {strides = array<i32>} : memref<8x128xf32, #tpu.memory_space<vmem>>, vector<8x128xf32>,
    return
  }
  func.func @transform_0(%arg0: i32, %arg1: i32) -> (i32, i32) {
    %c0_i32 = arith.constant 0 : i32
    %c0_i32_0 = arith.constant 0 : i32
    return %arg0, %c0_i32 : i32, i32
  }
  func.func @transform_1(%arg0: i32, %arg1: i32) -> (i32, i32) {
    %c0_i32 = arith.constant 0 : i32
    %c0_i32_0 = arith.constant 0 : i32
    return %c0_i32, %arg1 : i32, i32
  }
  func.func @transform_2(%arg0: i32, %arg1: i32) -> (i32, i32) {
    %c0_i32 = arith.constant 0 : i32
    %c0_i32_0 = arith.constant 0 : i32
    return %c0_i32, %arg1 : i32, i32
  }
  func.func @transform_3(%arg0: i32, %arg1: i32) -> (i32, i32) {
    %c0_i32 = arith.constant 0 : i32
    return %arg0, %arg1 : i32, i32
  }
}

</mosaic_0001>

<bundles_post_ra>
// kernel: projection_forward.1
= control target key start
LH: loop header
LB: loop body
LE: loop exit
PB: predicated region body
PF: predicated region fallthrough
CT: control target
= control target key end

     0   :  { %8 = vsyncpa [#allocation3], 0  ;;  %s295_s0 = inlined_call_operand.vmem [shape: bf16[8,128], index: 0, kind: input, shape index: {}]   ;;  %s296_s1 = inlined_call_operand.hbm [shape: bf16[128,128], index: 1, kind: input, shape index: {}]   ;;  %s297_s2 = inlined_call_operand.vmem [shape: f32[1,128], index: 2, kind: input, shape index: {}]   ;;  %s298_s3 = inlined_call_operand.hbm [shape: f32[8,128], index: 3, kind: output, shape index: {}]  }
   0x1   :  { %9 = vsyncpa [#allocation4], 0  ;;  %s257_s12 = smov [#allocation2]  }
   0x2   :  { %s17_s13 = sshll.u32 %s257_s12, 4  ;;  %s18_s13 = int_to_ptr.vmem [resolvable:$true] %s17_s13 }
   0x3   :  { %s221_s14 = scalar_lea.vmem %s18_s13, 1024  ;;  %p226_p1 = scmp.lt.s32.totalorder %s18_s13, %s18_s13 }
   0x4   :  { %p222_p0 = scmp.ne.s32.totalorder %s18_s13, %s221_s14  ;;  %p227_p2 = scmp.lt.s32.totalorder %s221_s14, %s221_s14 }
   0x6   :  { %p228_p3 = por %p227_p2, %p226_p1 }
   0x8   :  { %p229_p4 = pnand %p228_p3, %p222_p0 }
   0xa   :  { %232 = shalt.err (!%p229_p4)
}
   0xb   :  { %s258_s15 = smov 64   ;;  %s259_s16 = smov 4  }
   0xc   :  { %23 = dma.hbm_to_vmem [thread:$0]  %s296_s1, 1024, %s18_s13, [#allocation3], %s258_s15, %s258_s15, %s259_s16  }
   0xd   :  { %253 = dma.done.wait [#allocation3], 1024  }
   0xe   :  { %254 = vsyncadd [#allocation3], 4294966272  ;;  %v260_v0 = vmov 0.0   ;;  %vm261_vm0 = vmmov 0   ;;  %v203_v1 = vld [vmem:[#allocation2 + $0x38] sm:$0xff]   ;;  %v204_v2 = vld [vmem:[#allocation2 + $0x30] sm:$0xff]  }
   0xf   :  { %177 = vmatprep.subr.bf16.mxu0 %v260_v0  ;;  %193 = vmatprep.mubr.msk.bf16.mxu0 %vm261_vm0, %v260_v0  ;;  %v205_v3 = vld [vmem:[#allocation2 + $0x28] sm:$0xff]   ;;  %v206_v4 = vld [vmem:[#allocation2 + $0x20] sm:$0xff]   ;;  %v207_v5 = vld [vmem:[#allocation2 + $0x18] sm:$0xff]   ;;  %s262_s22 = smov [#allocation5]  }
  0x10   :  { %178 = vmatpush3.bf16.msra.mxu0 %v203_v1  ;;  %v208_v6 = vld [vmem:[#allocation2 + $0x10] sm:$0xff]   ;;  %v209_v7 = vld [vmem:[#allocation2 + $0x8] sm:$0xff]   ;;  %v210_v8 = vld [vmem:[#allocation2] sm:$0xff]   ;;  %s150_s23 = sshll.u32 %s262_s22, 4  ;;  %s151_s23 = int_to_ptr.vmem [resolvable:$true] %s150_s23 }
  0x11   :  { %179 = vmatprep.subr.bf16.mxu0 %v260_v0  ;;  %v30_v9 = vld [vmem:[%s295_s0] sm:$0xf]  ;;  %s233_s24 = scalar_lea.vmem %s151_s23, 128  ;;  %p238_p6 = scmp.lt.s32.totalorder %s151_s23, %s151_s23 }
  0x12   :  { %v159_v10 = vld [vmem:[%s297_s2] ss:$0 sm:$0xff]  ;;  %p234_p5 = scmp.ne.s32.totalorder %s151_s23, %s233_s24  ;;  %p239_p7 = scmp.lt.s32.totalorder %s233_s24, %s233_s24 }
  0x14   :  { %180 = vmatpush3.bf16.msra.mxu0 %v204_v2  ;;  %p240_p8 = por %p239_p7, %p238_p6 }
  0x15   :  { %181 = vmatprep.subr.bf16.mxu0 %v260_v0 }
  0x16   :  { %p241_p9 = pnand %p240_p8, %p234_p5 }
  0x18   :  { %182 = vmatpush3.bf16.msra.mxu0 %v205_v3 }
  0x19   :  { %183 = vmatprep.subr.bf16.mxu0 %v260_v0 }
  0x1c   :  { %184 = vmatpush3.bf16.msra.mxu0 %v206_v4 }
  0x1d   :  { %185 = vmatprep.subr.bf16.mxu0 %v260_v0 }
  0x20   :  { %186 = vmatpush3.bf16.msra.mxu0 %v207_v5 }
  0x21   :  { %187 = vmatprep.subr.bf16.mxu0 %v260_v0 }
  0x24   :  { %188 = vmatpush3.bf16.msra.mxu0 %v208_v6 }
  0x25   :  { %189 = vmatprep.subr.bf16.mxu0 %v260_v0 }
  0x28   :  { %190 = vmatpush3.bf16.msra.mxu0 %v209_v7 }
  0x29   :  { %191 = vmatprep.subr.bf16.mxu0 %v260_v0 }
  0x2c   :  { %192 = vmatpush3.bf16.msra.mxu0 %v210_v8 }
  0x2f   :  { %194 = vmatmul.mubr.bf16.vlgmr.msra.gmra.mxu0 %v30_v9 }
  0xef   :  { %v136_v11 = vpop.f32.mrf.mxu0 }
  0xf0   :  { %v137_v12 = vadd.f32 %v159_v10, %v136_v11 }
  0xf1   :  { %v195_v13 = vpop.f32.mrf.mxu0 }
  0xf2   :  { %211 = vtanh.f32 %v137_v12 }
  0xf3   :  { %v139_v14 = vpop.f32.mrf.mxu0 }
  0xf5   :  { %v196_v15 = vpop.f32.mrf.mxu0 }
  0xff   :  { %v212_v16 = vpop.eup %211 }
 0x100   :  { %143 = vst [vmem:[#allocation5] sm:$0xff] %v212_v16 }
 0x101   :  { %244 = shalt.err (!%p241_p9)
}
 0x102   :  { %153 = dma.vmem_to_hbm [thread:$0]  %s151_s23, 128, %s298_s3, [#allocation4]  }
 0x103   :  { %255 = dma.done.wait [#allocation4], 128  }
 0x104   :  { %256 = vsyncadd [#allocation4], 4294967168 }
 0x105   :  { %157 = vsyncpa [#allocation3], 1 }
 0x106   :  { %158 = vsyncpa [#allocation4], 1 }

</bundles_post_ra>
